<compile_context>
chip_gen: v6e
topology: v6e:2x2x1
jax: 0.10.0
libtpu: 0.0.40
codegen_flags: <defaults>
</compile_context>

<pallas_src>
import functools

import jax
import jax.numpy as jnp
from jax.experimental import pallas as pl
from jax.experimental.pallas import tpu as pltpu


def _round_up(x, m):
    return pl.cdiv(x, m) * m


# ---------------------------------------------------------------------------
# Path A kernel: W*H % 128 == 0.  Inputs viewed as (N, C, R, 128), R = W*H/128.
# Channels are a leading block dim -> channel reductions are plain VPU ops.
# ---------------------------------------------------------------------------
def _kd_kernel_rows(s_ref, t_ref, o_ref, acc_ref, *, valid_rows, r_tile):
    """s_ref/t_ref: (b, C, r, 128); o_ref: (b, 1); acc_ref: (b, r, 128) f32."""
    j = pl.program_id(1)
    n_j = pl.num_programs(1)
    n_ch = s_ref.shape[1]

    @pl.when(j == 0)
    def _():
        acc_ref[...] = jnp.zeros_like(acc_ref)

    # Pass 1: per-pixel channel maxima (C-1 elementwise maxima, VPU only).
    t_max = t_ref[:, 0].astype(jnp.float32)          # (b, r, 128)
    s_max = s_ref[:, 0].astype(jnp.float32)
    for c in range(1, n_ch):
        t_max = jnp.maximum(t_max, t_ref[:, c].astype(jnp.float32))
        s_max = jnp.maximum(s_max, s_ref[:, c].astype(jnp.float32))

    # Pass 2: accumulate softmax numerators/denominators.  Re-reads the VMEM
    # block (cheap) instead of holding C-wide f32 copies live.
    denom = jnp.zeros_like(t_max)   # sum_c exp(t_c - t_max)
    z_s = jnp.zeros_like(s_max)     # sum_c exp(s_c - s_max)
    num = jnp.zeros_like(t_max)     # sum_c w_c * (s_c - s_max)
    for c in range(n_ch):
        w_c = jnp.exp(t_ref[:, c].astype(jnp.float32) - t_max)
        sh_c = s_ref[:, c].astype(jnp.float32) - s_max
        denom = denom + w_c
        z_s = z_s + jnp.exp(sh_c)
        num = num + w_c * sh_c

    # Per pixel: -sum_c softmax(t)_c * log_softmax(s)_c
    #          = log(z_s) - num / denom
    partial = jnp.log(z_s) - num * pl.reciprocal(denom, approx=False)

    if valid_rows is not None:
        # Boundary block: out-of-range rows hold unspecified data; mask with a
        # select (NOT a multiply) so NaN/Inf cannot leak into the accumulator.
        row = jax.lax.broadcasted_iota(jnp.int32, partial.shape, 1)
        partial = jnp.where(j * r_tile + row < valid_rows, partial, 0.0)

    acc_ref[...] += partial

    @pl.when(j == n_j - 1)
    def _():
        per_row = jnp.sum(acc_ref[...], axis=2)                 # (b, r)
        o_ref[...] = jnp.sum(per_row, axis=1, keepdims=True)    # (b, 1)


# ---------------------------------------------------------------------------
# Path B kernel (fallback): W*H not a multiple of 128.  Inputs (N, C, W*H),
# channels on sublanes, flattened spatial on lanes.
# ---------------------------------------------------------------------------
def _kd_kernel_lanes(s_ref, t_ref, o_ref, acc_ref, *, valid_wh, tile):
    """s_ref/t_ref: (1, C, T); o_ref: (1, 1); acc_ref: (1, T) f32."""
    j = pl.program_id(1)
    n_j = pl.num_programs(1)

    @pl.when(j == 0)
    def _():
        acc_ref[...] = jnp.zeros_like(acc_ref)

    s = s_ref[...].astype(jnp.float32)               # (1, C, T)
    t = t_ref[...].astype(jnp.float32)

    t_max = jnp.max(t, axis=1, keepdims=True)        # (1, 1, T)
    w = jnp.exp(t - t_max)                           # (1, C, T)
    denom = jnp.sum(w, axis=1)                       # (1, T)

    s_max = jnp.max(s, axis=1, keepdims=True)
    s_shift = s - s_max
    z_s = jnp.sum(jnp.exp(s_shift), axis=1)          # (1, T)
    num = jnp.sum(w * s_shift, axis=1)               # (1, T)

    partial = jnp.log(z_s) - num * pl.reciprocal(denom, approx=False)

    if valid_wh is not None:
        lane = jax.lax.broadcasted_iota(jnp.int32, partial.shape, 1)
        partial = jnp.where(j * tile + lane < valid_wh, partial, 0.0)

    acc_ref[...] += partial

    @pl.when(j == n_j - 1)
    def _():
        o_ref[0, 0] = jnp.sum(acc_ref[...])


# ---------------------------------------------------------------------------
# Tiling / budget helpers
# ---------------------------------------------------------------------------
def _vmem_limit_bytes():
    """Generation-aware scoped-VMEM limit (~40 MiB on v7x, ~80 MiB on v5e/v6e)."""
    try:
        phys = int(pltpu.get_tpu_info().vmem_capacity_bytes)
    except Exception:
        phys = 64 * 1024 * 1024  # conservative: v7x physical VMEM
    return int(min(phys * 5 // 8, 80 * 1024 * 1024))


# ~4 MiB of input DMA per grid step: dwarfs the ~0.35us fixed per-step
# overhead even at v7x's 3.2 TB/s (and is more than enough on v5e/v6e).
_STEP_INPUT_TARGET = 4 * 1024 * 1024


def _pick_tiling_rows(N, C, R, itemsize, scoped_limit):
    """(b_tile, n_b, r_tile, n_row, mask_rows) for the (N, C, R, 128) layout."""
    # Live VMEM per (sublane-row x 128 lanes) unit of block:
    #   inputs: 2 arrays x 2 pipeline buffers x C channels x itemsize
    #   + ~12 row-wide f32 vectors (maxes, denom, z_s, num, w_c, sh_c, acc, ...)
    per_row = C * 128 * 4 * itemsize + 128 * 4 * 12
    budget_rows = max(8, (scoped_limit // 2) // per_row)      # keep 2x headroom
    target_rows = max(8, _STEP_INPUT_TARGET // max(1, 2 * C * 128 * itemsize))
    rows_per_step = min(budget_rows, target_rows)

    if R <= rows_per_step:
        # Whole spatial extent in one step; fold whole batch elements together
        # when they are tiny (amortizes per-step overhead).  b_tile stays in
        # {1, N} so the output block is either (1, 1) or full-extent (N, 1).
        r_tile, n_row, mask_rows = R, 1, False
        b_tile = N if N * R <= rows_per_step else 1
    else:
        rows8 = max(8, (rows_per_step // 8) * 8)
        n_row = pl.cdiv(R, rows8)
        r_tile = _round_up(pl.cdiv(R, n_row), 8)   # minimal boundary padding
        n_row = pl.cdiv(R, r_tile)
        mask_rows = (R % r_tile) != 0
        b_tile = 1
    return b_tile, pl.cdiv(N, b_tile), r_tile, n_row, mask_rows


def _pick_tiling_lanes(C, WH, itemsize, scoped_limit):
    """(tile, n_tiles, needs_mask) for the (N, C, W*H) lane layout."""
    sub = (8 * 4) // itemsize                # dtype-correct sublane padding
    c_in = _round_up(C, sub)                 # padded channels of an input block
    c_f32 = _round_up(C, 8)                  # padded channels of f32 temporaries
    per_lane = c_in * 4 * itemsize + c_f32 * 5 * 4 + 4 * 8
    budget_lanes = max(128, (scoped_limit // 2) // per_lane)
    target_lanes = max(128, _STEP_INPUT_TARGET // max(1, 2 * c_in * itemsize))
    max_t = min(budget_lanes, target_lanes)

    if WH <= max_t:
        # Single full-extent block: allowed for a non-128-multiple last dim
        # when the block dim equals the array dim.  No mask, no padding.
        return WH, 1, False
    max_t = max(128, (max_t // 128) * 128)
    n_tiles = pl.cdiv(WH, max_t)
    tile = _round_up(pl.cdiv(WH, n_tiles), 128)   # minimal boundary padding
    n_tiles = pl.cdiv(WH, tile)
    return tile, n_tiles, (WH % tile) != 0


# ---------------------------------------------------------------------------
# Wrapper
# ---------------------------------------------------------------------------
@jax.jit
def criterion_pixel_wise(preds_S, preds_T):
    assert preds_S.shape == preds_T.shape, (
        "the output dim of teacher and student differ"
    )
    N, C, W, H = preds_S.shape
    WH = W * H
    itemsize = jnp.dtype(preds_S.dtype).itemsize
    vmem_limit = _vmem_limit_bytes()

    if WH % 128 == 0:
        # Path A: spatial folded into (rows, 128); channels on a leading dim.
        R = WH // 128
        b_tile, n_b, r_tile, n_row, mask_rows = _pick_tiling_rows(
            N, C, R, itemsize, vmem_limit)
        s = preds_S.reshape(N, C, R, 128)   # contiguous reshape: no HBM copy
        t = preds_T.reshape(N, C, R, 128)
        kernel = functools.partial(
            _kd_kernel_rows,
            valid_rows=(R if mask_rows else None),
            r_tile=r_tile)
        partials = pl.pallas_call(
            kernel,
            out_shape=jax.ShapeDtypeStruct((N, 1), jnp.float32),
            grid_spec=pltpu.PrefetchScalarGridSpec(
                num_scalar_prefetch=0,
                grid=(n_b, n_row),
                in_specs=[
                    pl.BlockSpec((b_tile, C, r_tile, 128),
                                 lambda i, j: (i, 0, j, 0)),
                    pl.BlockSpec((b_tile, C, r_tile, 128),
                                 lambda i, j: (i, 0, j, 0)),
                ],
                out_specs=pl.BlockSpec((b_tile, 1), lambda i, j: (i, 0)),
                scratch_shapes=[pltpu.VMEM((b_tile, r_tile, 128), jnp.float32)],
            ),
            compiler_params=pltpu.CompilerParams(
                dimension_semantics=("parallel", "arbitrary"),
                vmem_limit_bytes=vmem_limit,
            ),
        )(s, t)
    else:
        # Path B: lane layout fallback.  No jnp.pad: boundary blocks + mask.
        tile, n_tiles, needs_mask = _pick_tiling_lanes(
            C, WH, itemsize, vmem_limit)
        s = preds_S.reshape(N, C, WH)
        t = preds_T.reshape(N, C, WH)
        kernel = functools.partial(
            _kd_kernel_lanes,
            valid_wh=(WH if needs_mask else None),
            tile=tile)
        partials = pl.pallas_call(
            kernel,
            out_shape=jax.ShapeDtypeStruct((N, 1), jnp.float32),
            grid_spec=pltpu.PrefetchScalarGridSpec(
                num_scalar_prefetch=0,
                grid=(N, n_tiles),
                in_specs=[
                    pl.BlockSpec((1, C, tile), lambda i, j: (i, 0, j)),
                    pl.BlockSpec((1, C, tile), lambda i, j: (i, 0, j)),
                ],
                out_specs=pl.BlockSpec((1, 1), lambda i, j: (i, 0)),
                scratch_shapes=[pltpu.VMEM((1, tile), jnp.float32)],
            ),
            compiler_params=pltpu.CompilerParams(
                dimension_semantics=("parallel", "arbitrary"),
                vmem_limit_bytes=vmem_limit,
            ),
        )(s, t)

    # Final normalization (glue): PyTorch divides by W then H (not by N).
    return jnp.sum(partials) / W / H


def _reference(preds_S, preds_T):
    """Pure-JAX reference matching the PyTorch module."""
    N, C, W, H = preds_S.shape
    s = preds_S.transpose(0, 2, 3, 1).reshape(-1, C).astype(jnp.float32)
    t = preds_T.transpose(0, 2, 3, 1).reshape(-1, C).astype(jnp.float32)
    p_t = jax.nn.softmax(t, axis=1)
    log_q = jax.nn.log_softmax(s, axis=1)
    return jnp.sum(-p_t * log_q) / W / H


if __name__ == "__main__":
    key = jax.random.PRNGKey(0)
    k1, k2, k3, k4 = jax.random.split(key, 4)

    # Case 1: W*H is a multiple of 128 (rows/sublane-folded path).
    N, C, W, H = 2, 4, 16, 16
    preds_S = jax.random.normal(k1, (N, C, W, H), dtype=jnp.float32)
    preds_T = jax.random.normal(k2, (N, C, W, H), dtype=jnp.float32)

    loss = jax.block_until_ready(criterion_pixel_wise(preds_S, preds_T))
    ref = jax.block_until_ready(_reference(preds_S, preds_T))
    assert jnp.allclose(loss, ref, rtol=1e-4, atol=1e-4), (loss, ref)

    # Case 2: W*H NOT a multiple of 128 (lane-layout fallback, no padding).
    N2, C2, W2, H2 = 2, 3, 10, 30
    preds_S2 = jax.random.normal(k3, (N2, C2, W2, H2), dtype=jnp.float32)
    preds_T2 = jax.random.normal(k4, (N2, C2, W2, H2), dtype=jnp.float32)

    loss2 = jax.block_until_ready(criterion_pixel_wise(preds_S2, preds_T2))
    ref2 = jax.block_until_ready(_reference(preds_S2, preds_T2))
    assert jnp.allclose(loss2, ref2, rtol=1e-4, atol=1e-4), (loss2, ref2)

    print("KERNEL_OK")
</pallas_src>

<mosaic_0001>
module attributes {stable_mosaic.version = 11 : i64} {
  func.func @_kd_kernel_rows(%arg0: i32, %arg1: i32, %arg2: memref<2x4x2x128xf32, #tpu.memory_space<vmem>>, %arg3: memref<2x4x2x128xf32, #tpu.memory_space<vmem>>, %arg4: memref<2x1xf32, #tpu.memory_space<vmem>>, %arg5: memref<2x2x128xf32, #tpu.memory_space<vmem>>) attributes {dimension_semantics = [#tpu.dimension_semantics<parallel>, #tpu.dimension_semantics<arbitrary>], iteration_bounds = array<i64: 1, 1>, scalar_prefetch = 0 : i64, scratch_operands = 1 : i64, tpu.core_type = #tpu.core_type<tc>, window_params = [{transform_indices = @transform_0, window_bounds = array<i64: 2, 4, 2, 128>}, {transform_indices = @transform_1, window_bounds = array<i64: 2, 4, 2, 128>}, {transform_indices = @transform_2, window_bounds = array<i64: 2, 1>}]} {
    %c0_i32 = arith.constant 0 : i32
    %0 = arith.cmpi eq, %arg1, %c0_i32 : i32
    %1 = arith.extui %0 : i1 to i32
    %c0_i32_0 = arith.constant 0 : i32
    %2 = arith.cmpi ne, %1, %c0_i32_0 : i32
    scf.if %2 {
      %cst_71 = arith.constant 0.000000e+00 : f32
      %86 = vector.broadcast %cst_71 : f32 to vector<2x2x128xf32>
      %c0_72 = arith.constant 0 : index
      %c0_73 = arith.constant 0 : index
      %c0_74 = arith.constant 0 : index
      %87 = vector.load %arg5[%c0_72, %c0_73, %c0_74] : memref<2x2x128xf32, #tpu.memory_space<vmem>>, vector<2x2x128xf32>
      tpu.vector_store %arg5[%c0_72, %c0_73, %c0_74], %86 {strides = array<i32>} : memref<2x2x128xf32, #tpu.memory_space<vmem>>, vector<2x2x128xf32>,
    } else {
    }
    %c0 = arith.constant 0 : index
    %c0_1 = arith.constant 0 : index
    %c0_2 = arith.constant 0 : index
    %c0_3 = arith.constant 0 : index
    %3 = vector.load %arg3[%c0, %c0_1, %c0_2, %c0_3] : memref<2x4x2x128xf32, #tpu.memory_space<vmem>>, vector<2x1x2x128xf32>
    %4 = vector.shape_cast %3 : vector<2x1x2x128xf32> to vector<2x2x128xf32>
    %c0_4 = arith.constant 0 : index
    %c0_5 = arith.constant 0 : index
    %c0_6 = arith.constant 0 : index
    %c0_7 = arith.constant 0 : index
    %5 = vector.load %arg2[%c0_4, %c0_5, %c0_6, %c0_7] : memref<2x4x2x128xf32, #tpu.memory_space<vmem>>, vector<2x1x2x128xf32>
    %6 = vector.shape_cast %5 : vector<2x1x2x128xf32> to vector<2x2x128xf32>
    %c0_8 = arith.constant 0 : index
    %c1 = arith.constant 1 : index
    %c0_9 = arith.constant 0 : index
    %c0_10 = arith.constant 0 : index
    %7 = vector.load %arg3[%c0_8, %c1, %c0_9, %c0_10] : memref<2x4x2x128xf32, #tpu.memory_space<vmem>>, vector<2x1x2x128xf32>
    %8 = vector.shape_cast %7 : vector<2x1x2x128xf32> to vector<2x2x128xf32>
    %9 = arith.maximumf %4, %8 : vector<2x2x128xf32>
    %c0_11 = arith.constant 0 : index
    %c1_12 = arith.constant 1 : index
    %c0_13 = arith.constant 0 : index
    %c0_14 = arith.constant 0 : index
    %10 = vector.load %arg2[%c0_11, %c1_12, %c0_13, %c0_14] : memref<2x4x2x128xf32, #tpu.memory_space<vmem>>, vector<2x1x2x128xf32>
    %11 = vector.shape_cast %10 : vector<2x1x2x128xf32> to vector<2x2x128xf32>
    %12 = arith.maximumf %6, %11 : vector<2x2x128xf32>
    %c0_15 = arith.constant 0 : index
    %c2 = arith.constant 2 : index
    %c0_16 = arith.constant 0 : index
    %c0_17 = arith.constant 0 : index
    %13 = vector.load %arg3[%c0_15, %c2, %c0_16, %c0_17] : memref<2x4x2x128xf32, #tpu.memory_space<vmem>>, vector<2x1x2x128xf32>
    %14 = vector.shape_cast %13 : vector<2x1x2x128xf32> to vector<2x2x128xf32>
    %15 = arith.maximumf %9, %14 : vector<2x2x128xf32>
    %c0_18 = arith.constant 0 : index
    %c2_19 = arith.constant 2 : index
    %c0_20 = arith.constant 0 : index
    %c0_21 = arith.constant 0 : index
    %16 = vector.load %arg2[%c0_18, %c2_19, %c0_20, %c0_21] : memref<2x4x2x128xf32, #tpu.memory_space<vmem>>, vector<2x1x2x128xf32>
    %17 = vector.shape_cast %16 : vector<2x1x2x128xf32> to vector<2x2x128xf32>
    %18 = arith.maximumf %12, %17 : vector<2x2x128xf32>
    %c0_22 = arith.constant 0 : index
    %c3 = arith.constant 3 : index
    %c0_23 = arith.constant 0 : index
    %c0_24 = arith.constant 0 : index
    %19 = vector.load %arg3[%c0_22, %c3, %c0_23, %c0_24] : memref<2x4x2x128xf32, #tpu.memory_space<vmem>>, vector<2x1x2x128xf32>
    %20 = vector.shape_cast %19 : vector<2x1x2x128xf32> to vector<2x2x128xf32>
    %21 = arith.maximumf %15, %20 : vector<2x2x128xf32>
    %c0_25 = arith.constant 0 : index
    %c3_26 = arith.constant 3 : index
    %c0_27 = arith.constant 0 : index
    %c0_28 = arith.constant 0 : index
    %22 = vector.load %arg2[%c0_25, %c3_26, %c0_27, %c0_28] : memref<2x4x2x128xf32, #tpu.memory_space<vmem>>, vector<2x1x2x128xf32>
    %23 = vector.shape_cast %22 : vector<2x1x2x128xf32> to vector<2x2x128xf32>
    %24 = arith.maximumf %18, %23 : vector<2x2x128xf32>
    %cst = arith.constant 0.000000e+00 : f32
    %25 = vector.broadcast %cst : f32 to vector<2x2x128xf32>
    %cst_29 = arith.constant 0.000000e+00 : f32
    %26 = vector.broadcast %cst_29 : f32 to vector<2x2x128xf32>
    %cst_30 = arith.constant 0.000000e+00 : f32
    %27 = vector.broadcast %cst_30 : f32 to vector<2x2x128xf32>
    %c0_31 = arith.constant 0 : index
    %c0_32 = arith.constant 0 : index
    %c0_33 = arith.constant 0 : index
    %c0_34 = arith.constant 0 : index
    %28 = vector.load %arg3[%c0_31, %c0_32, %c0_33, %c0_34] : memref<2x4x2x128xf32, #tpu.memory_space<vmem>>, vector<2x1x2x128xf32>
    %29 = vector.shape_cast %28 : vector<2x1x2x128xf32> to vector<2x2x128xf32>
    %30 = arith.subf %29, %21 : vector<2x2x128xf32>
    %31 = math.exp %30 : vector<2x2x128xf32>
    %c0_35 = arith.constant 0 : index
    %c0_36 = arith.constant 0 : index
    %c0_37 = arith.constant 0 : index
    %c0_38 = arith.constant 0 : index
    %32 = vector.load %arg2[%c0_35, %c0_36, %c0_37, %c0_38] : memref<2x4x2x128xf32, #tpu.memory_space<vmem>>, vector<2x1x2x128xf32>
    %33 = vector.shape_cast %32 : vector<2x1x2x128xf32> to vector<2x2x128xf32>
    %34 = arith.subf %33, %24 : vector<2x2x128xf32>
    %35 = arith.addf %25, %31 : vector<2x2x128xf32>
    %36 = math.exp %34 : vector<2x2x128xf32>
    %37 = arith.addf %26, %36 : vector<2x2x128xf32>
    %38 = arith.mulf %31, %34 : vector<2x2x128xf32>
    %39 = arith.addf %27, %38 : vector<2x2x128xf32>
    %c0_39 = arith.constant 0 : index
    %c1_40 = arith.constant 1 : index
    %c0_41 = arith.constant 0 : index
    %c0_42 = arith.constant 0 : index
    %40 = vector.load %arg3[%c0_39, %c1_40, %c0_41, %c0_42] : memref<2x4x2x128xf32, #tpu.memory_space<vmem>>, vector<2x1x2x128xf32>
    %41 = vector.shape_cast %40 : vector<2x1x2x128xf32> to vector<2x2x128xf32>
    %42 = arith.subf %41, %21 : vector<2x2x128xf32>
    %43 = math.exp %42 : vector<2x2x128xf32>
    %c0_43 = arith.constant 0 : index
    %c1_44 = arith.constant 1 : index
    %c0_45 = arith.constant 0 : index
    %c0_46 = arith.constant 0 : index
    %44 = vector.load %arg2[%c0_43, %c1_44, %c0_45, %c0_46] : memref<2x4x2x128xf32, #tpu.memory_space<vmem>>, vector<2x1x2x128xf32>
    %45 = vector.shape_cast %44 : vector<2x1x2x128xf32> to vector<2x2x128xf32>
    %46 = arith.subf %45, %24 : vector<2x2x128xf32>
    %47 = arith.addf %35, %43 : vector<2x2x128xf32>
    %48 = math.exp %46 : vector<2x2x128xf32>
    %49 = arith.addf %37, %48 : vector<2x2x128xf32>
    %50 = arith.mulf %43, %46 : vector<2x2x128xf32>
    %51 = arith.addf %39, %50 : vector<2x2x128xf32>
    %c0_47 = arith.constant 0 : index
    %c2_48 = arith.constant 2 : index
    %c0_49 = arith.constant 0 : index
    %c0_50 = arith.constant 0 : index
    %52 = vector.load %arg3[%c0_47, %c2_48, %c0_49, %c0_50] : memref<2x4x2x128xf32, #tpu.memory_space<vmem>>, vector<2x1x2x128xf32>
    %53 = vector.shape_cast %52 : vector<2x1x2x128xf32> to vector<2x2x128xf32>
    %54 = arith.subf %53, %21 : vector<2x2x128xf32>
    %55 = math.exp %54 : vector<2x2x128xf32>
    %c0_51 = arith.constant 0 : index
    %c2_52 = arith.constant 2 : index
    %c0_53 = arith.constant 0 : index
    %c0_54 = arith.constant 0 : index
    %56 = vector.load %arg2[%c0_51, %c2_52, %c0_53, %c0_54] : memref<2x4x2x128xf32, #tpu.memory_space<vmem>>, vector<2x1x2x128xf32>
    %57 = vector.shape_cast %56 : vector<2x1x2x128xf32> to vector<2x2x128xf32>
    %58 = arith.subf %57, %24 : vector<2x2x128xf32>
    %59 = arith.addf %47, %55 : vector<2x2x128xf32>
    %60 = math.exp %58 : vector<2x2x128xf32>
    %61 = arith.addf %49, %60 : vector<2x2x128xf32>
    %62 = arith.mulf %55, %58 : vector<2x2x128xf32>
    %63 = arith.addf %51, %62 : vector<2x2x128xf32>
    %c0_55 = arith.constant 0 : index
    %c3_56 = arith.constant 3 : index
    %c0_57 = arith.constant 0 : index
    %c0_58 = arith.constant 0 : index
    %64 = vector.load %arg3[%c0_55, %c3_56, %c0_57, %c0_58] : memref<2x4x2x128xf32, #tpu.memory_space<vmem>>, vector<2x1x2x128xf32>
    %65 = vector.shape_cast %64 : vector<2x1x2x128xf32> to vector<2x2x128xf32>
    %66 = arith.subf %65, %21 : vector<2x2x128xf32>
    %67 = math.exp %66 : vector<2x2x128xf32>
    %c0_59 = arith.constant 0 : index
    %c3_60 = arith.constant 3 : index
    %c0_61 = arith.constant 0 : index
    %c0_62 = arith.constant 0 : index
    %68 = vector.load %arg2[%c0_59, %c3_60, %c0_61, %c0_62] : memref<2x4x2x128xf32, #tpu.memory_space<vmem>>, vector<2x1x2x128xf32>
    %69 = vector.shape_cast %68 : vector<2x1x2x128xf32> to vector<2x2x128xf32>
    %70 = arith.subf %69, %24 : vector<2x2x128xf32>
    %71 = arith.addf %59, %67 : vector<2x2x128xf32>
    %72 = math.exp %70 : vector<2x2x128xf32>
    %73 = arith.addf %61, %72 : vector<2x2x128xf32>
    %74 = arith.mulf %67, %70 : vector<2x2x128xf32>
    %75 = arith.addf %63, %74 : vector<2x2x128xf32>
    %76 = math.log %73 : vector<2x2x128xf32>
    %77 = tpu.reciprocal %71 : vector<2x2x128xf32> -> vector<2x2x128xf32>
    %78 = arith.mulf %75, %77 : vector<2x2x128xf32>
    %79 = arith.subf %76, %78 : vector<2x2x128xf32>
    %c0_63 = arith.constant 0 : index
    %c0_64 = arith.constant 0 : index
    %c0_65 = arith.constant 0 : index
    %80 = vector.load %arg5[%c0_63, %c0_64, %c0_65] : memref<2x2x128xf32, #tpu.memory_space<vmem>>, vector<2x2x128xf32>
    %81 = arith.addf %80, %79 : vector<2x2x128xf32>
    %c0_66 = arith.constant 0 : index
    %c0_67 = arith.constant 0 : index
    %c0_68 = arith.constant 0 : index
    %82 = vector.load %arg5[%c0_66, %c0_67, %c0_68] : memref<2x2x128xf32, #tpu.memory_space<vmem>>, vector<2x2x128xf32>
    tpu.vector_store %arg5[%c0_66, %c0_67, %c0_68], %81 {strides = array<i32>} : memref<2x2x128xf32, #tpu.memory_space<vmem>>, vector<2x2x128xf32>,
    %c0_i32_69 = arith.constant 0 : i32
    %83 = arith.cmpi eq, %arg1, %c0_i32_69 : i32
    %84 = arith.extui %83 : i1 to i32
    %c0_i32_70 = arith.constant 0 : i32
    %85 = arith.cmpi ne, %84, %c0_i32_70 : i32
    scf.if %85 {
      %c0_71 = arith.constant 0 : index
      %c0_72 = arith.constant 0 : index
      %c0_73 = arith.constant 0 : index
      %86 = vector.load %arg5[%c0_71, %c0_72, %c0_73] : memref<2x2x128xf32, #tpu.memory_space<vmem>>, vector<2x2x128xf32>
      %cst_74 = arith.constant dense<0.000000e+00> : vector<2x2xf32>
      %87 = vector.multi_reduction <add>, %86, %cst_74 [2] : vector<2x2x128xf32> to vector<2x2xf32>
      %cst_75 = arith.constant dense<0.000000e+00> : vector<2xf32>
      %88 = vector.multi_reduction <add>, %87, %cst_75 [1] : vector<2x2xf32> to vector<2xf32>
      %89 = vector.shape_cast %88 : vector<2xf32> to vector<2x1xf32>
      %c0_76 = arith.constant 0 : index
      %c0_77 = arith.constant 0 : index
      %90 = vector.load %arg4[%c0_76, %c0_77] : memref<2x1xf32, #tpu.memory_space<vmem>>, vector<2x1xf32>
      tpu.vector_store %arg4[%c0_76, %c0_77], %89 {strides = array<i32>} : memref<2x1xf32, #tpu.memory_space<vmem>>, vector<2x1xf32>,
    } else {
    }
    return
  }
  func.func @transform_0(%arg0: i32, %arg1: i32) -> (i32, i32, i32, i32) {
    %c0_i32 = arith.constant 0 : i32
    %c0_i32_0 = arith.constant 0 : i32
    %c0_i32_1 = arith.constant 0 : i32
    return %arg0, %c0_i32, %arg1, %c0_i32_0 : i32, i32, i32, i32
  }
  func.func @transform_1(%arg0: i32, %arg1: i32) -> (i32, i32, i32, i32) {
    %c0_i32 = arith.constant 0 : i32
    %c0_i32_0 = arith.constant 0 : i32
    %c0_i32_1 = arith.constant 0 : i32
    return %arg0, %c0_i32, %arg1, %c0_i32_0 : i32, i32, i32, i32
  }
  func.func @transform_2(%arg0: i32, %arg1: i32) -> (i32, i32) {
    %c0_i32 = arith.constant 0 : i32
    %c0_i32_0 = arith.constant 0 : i32
    return %arg0, %c0_i32 : i32, i32
  }
}

</mosaic_0001>

<bundles_post_ra>
// kernel: criterion_pixel_wise.1
= control target key start
LH: loop header
LB: loop body
LE: loop exit
PB: predicated region body
PF: predicated region fallthrough
CT: control target
= control target key end

     0   :  { %v237_v0 = vmov 0.0   ;;  %vm152_vm0 = vcmask 1041408   ;;  %vm171_vm1 = vcmask 1041409   ;;  %vm174_vm2 = vcmask 9216   ;;  %s316_s0 = inlined_call_operand.vmem [shape: f32[2,4,2,128], index: 0, kind: input, shape index: {}]   ;;  %s317_s1 = inlined_call_operand.vmem [shape: f32[2,4,2,128], index: 1, kind: input, shape index: {}]   ;;  %s318_s2 = inlined_call_operand.vmem [shape: f32[2,1], index: 2, kind: output, shape index: {}]  }
   0x1   :  { %15 = vst [vmem:[#allocation2] sm:$0x3] %v237_v0  ;;  %v17_v1 = vld [vmem:[%s317_s1] sm:$0x3]  ;;  %v184_v3 = vld [vmem:[%s317_s1 + $0x2] sm:$0x3] }
   0x2   :  { %v19_v2 = vld [vmem:[%s316_s0] sm:$0x3]  ;;  %16 = vst [vmem:[#allocation2 + $0x2] sm:$0x3] %v237_v0  ;;  %v24_v4 = vmax.f32 %v17_v1, %v184_v3  ;;  %v186_v5 = vld [vmem:[%s316_s0 + $0x2] sm:$0x3] }
   0x3   :  { %v188_v6 = vld [vmem:[%s317_s1 + $0x4] sm:$0x3]  ;;  %v29_v8 = vmax.f32 %v19_v2, %v186_v5  ;;  %v192_v9 = vld [vmem:[%s317_s1 + $0x6] sm:$0x3]  ;;  %v18_v11 = vld [vmem:[%s317_s1 + $0x8] sm:$0x3] }
   0x4   :  { %v190_v7 = vld [vmem:[%s316_s0 + $0x4] sm:$0x3]  ;;  %v194_v10 = vld [vmem:[%s316_s0 + $0x6] sm:$0x3]  ;;  %v34_v12 = vmax.f32 %v24_v4, %v188_v6  ;;  %v20_v13 = vld [vmem:[%s316_s0 + $0x8] sm:$0x3] }
   0x5   :  { %v185_v14 = vld [vmem:[%s317_s1 + $0xa] sm:$0x3]  ;;  %v39_v16 = vmax.f32 %v29_v8, %v190_v7  ;;  %v189_v19 = vld [vmem:[%s317_s1 + $0xc] sm:$0x3]  ;;  %v193_v25 = vld [vmem:[%s317_s1 + $0xe] sm:$0x3] }
   0x6   :  { %v187_v15 = vld [vmem:[%s316_s0 + $0xa] sm:$0x3]  ;;  %v25_v17 = vmax.f32 %v18_v11, %v185_v14  ;;  %v191_v20 = vld [vmem:[%s316_s0 + $0xc] sm:$0x3]  ;;  %v44_v21 = vmax.f32 %v34_v12, %v192_v9  ;;  %v195_v29 = vld [vmem:[%s316_s0 + $0xe] sm:$0x3] }
   0x7   :  { %v30_v18 = vmax.f32 %v20_v13, %v187_v15  ;;  %v49_v22 = vmax.f32 %v39_v16, %v194_v10  ;;  %vm178_vm3 = vcmask 1024  }
   0x8   :  { %v35_v23 = vmax.f32 %v25_v17, %v189_v19  ;;  %v51_v26 = vsub.f32 %v17_v1, %v44_v21  ;;  %v71_v27 = vsub.f32 %v184_v3, %v44_v21  ;;  %v91_v28 = vsub.f32 %v188_v6, %v44_v21 }
   0x9   :  { %v40_v24 = vmax.f32 %v30_v18, %v191_v20  ;;  %v57_v30 = vsub.f32 %v19_v2, %v49_v22  ;;  %v77_v31 = vsub.f32 %v186_v5, %v49_v22  ;;  %v301_v32 = vsub.f32 %v190_v7, %v49_v22 }
   0xa   :  { %v53_v33 = vmul.f32 1.442695, %v51_v26  ;;  %v73_v34 = vmul.f32 1.442695, %v71_v27  ;;  %v111_v35 = vsub.f32 %v192_v9, %v44_v21  ;;  %v45_v36 = vmax.f32 %v35_v23, %v193_v25 }
   0xb   :  { %v61_v37 = vmul.f32 1.442695, %v57_v30  ;;  %v81_v38 = vmul.f32 1.442695, %v77_v31  ;;  %v303_v39 = vsub.f32 %v194_v10, %v49_v22  ;;  %v50_v40 = vmax.f32 %v40_v24, %v195_v29 }
   0xc   :  { %197 = vpow2.f32 %v53_v33  ;;  %v93_v41 = vmul.f32 1.442695, %v91_v28  ;;  %v52_v42 = vsub.f32 %v18_v11, %v45_v36  ;;  %v101_v43 = vmul.f32 1.442695, %v301_v32 }
   0xd   :  { %199 = vpow2.f32 %v61_v37  ;;  %v306_v44 = vsub.f32 %v20_v13, %v50_v40  ;;  %v113_v45 = vmul.f32 1.442695, %v111_v35  ;;  %v72_v46 = vsub.f32 %v185_v14, %v45_v36 }
   0xe   :  { %201 = vpow2.f32 %v73_v34  ;;  %v121_v47 = vmul.f32 1.442695, %v303_v39  ;;  %v78_v48 = vsub.f32 %v187_v15, %v50_v40  ;;  %v55_v49 = vmul.f32 1.442695, %v52_v42 }
   0xf   :  { %203 = vpow2.f32 %v81_v38  ;;  %v92_v50 = vsub.f32 %v189_v19, %v45_v36  ;;  %v63_v51 = vmul.f32 1.442695, %v306_v44  ;;  %v98_v52 = vsub.f32 %v191_v20, %v50_v40 }
  0x10   :  { %205 = vpow2.f32 %v93_v41  ;;  %v75_v53 = vmul.f32 1.442695, %v72_v46  ;;  %v112_v54 = vsub.f32 %v193_v25, %v45_v36  ;;  %v83_v55 = vmul.f32 1.442695, %v78_v48 }
  0x11   :  { %207 = vpow2.f32 %v101_v43  ;;  %v118_v56 = vsub.f32 %v195_v29, %v50_v40  ;;  %v95_v57 = vmul.f32 1.442695, %v92_v50  ;;  %v103_v58 = vmul.f32 1.442695, %v98_v52  ;;  %v141_v43 = vld [vmem:[#allocation2] sm:$0x3] }
  0x12   :  { %209 = vpow2.f32 %v113_v45  ;;  %v115_v59 = vmul.f32 1.442695, %v112_v54  ;;  %v142_v50 = vld [vmem:[#allocation2 + $0x2] sm:$0x3] }
  0x13   :  { %211 = vpow2.f32 %v121_v47  ;;  %v123_v60 = vmul.f32 1.442695, %v118_v56 }
  0x14   :  { %213 = vpow2.f32 %v55_v49 }
  0x15   :  { %215 = vpow2.f32 %v63_v51 }
  0x16   :  { %217 = vpow2.f32 %v75_v53 }
  0x17   :  { %219 = vpow2.f32 %v83_v55 }
  0x18   :  { %221 = vpow2.f32 %v95_v57  ;;  %v161_v57 = vlaneseq }
  0x19   :  { %v198_v61 = vpop.eup %197  ;;  %223 = vpow2.f32 %v103_v58 }
  0x1a   :  { %v200_v62 = vpop.eup %199  ;;  %225 = vpow2.f32 %v115_v59  ;;  %v67_v7 = vmul.f32 %v198_v61, %v57_v30  ;;  %v162_v58 = vand.u32 127, %v161_v57  ;;  %v164_v59 = vshrl.u32 %v161_v57, 7 }
  0x1b   :  { %v202_v63 = vpop.eup %201  ;;  %227 = vpow2.f32 %v123_v60 }
  0x1c   :  { %v204_v0 = vpop.eup %203  ;;  %v79_v1 = vadd.f32 %v202_v63, %v198_v61  ;;  %v87_v8 = vmul.f32 %v202_v63, %v77_v31  ;;  %v165_v61 = vsub.s32 %v162_v58, %v164_v59 }
  0x1d   :  { %v206_v2 = vpop.eup %205  ;;  %v85_v3 = vadd.f32 %v204_v0, %v200_v62 }
  0x1e   :  { %v208_v4 = vpop.eup %207  ;;  %v99_v5 = vadd.f32 %v206_v2, %v79_v1  ;;  %v89_v16 = vadd.f32 %v87_v8, %v67_v7  ;;  %v107_v17 = vmul.f32 %v206_v2, %v301_v32 }
  0x1f   :  { %v210_v6 = vpop.eup %209  ;;  %v105_v9 = vadd.f32 %v208_v4, %v85_v3 }
  0x20   :  { %v212_v10 = vpop.eup %211  ;;  %v119_v11 = vadd.f32 %v210_v6, %v99_v5  ;;  %v109_v25 = vadd.f32 %v107_v17, %v89_v16  ;;  %v127_v28 = vmul.f32 %v210_v6, %v303_v39 }
  0x21   :  { %v214_v12 = vpop.eup %213  ;;  %v125_v13 = vadd.f32 %v212_v10, %v105_v9 }
  0x22   :  { %v216_v14 = vpop.eup %215  ;;  %229 = vrcp.f32 %v119_v11  ;;  %v68_v29 = vmul.f32 %v214_v12, %v306_v44  ;;  %v129_v32 = vadd.f32 %v127_v28, %v109_v25 }
  0x23   :  { %v218_v15 = vpop.eup %217  ;;  %231 = vlog2.f32 %v125_v13 }
  0x24   :  { %v220_v18 = vpop.eup %219  ;;  %v80_v19 = vadd.f32 %v218_v15, %v214_v12  ;;  %v88_v30 = vmul.f32 %v218_v15, %v78_v48 }
  0x25   :  { %v222_v20 = vpop.eup %221  ;;  %v86_v21 = vadd.f32 %v220_v18, %v216_v14 }
  0x26   :  { %v224_v22 = vpop.eup %223  ;;  %v100_v23 = vadd.f32 %v222_v20, %v80_v19  ;;  %v90_v34 = vadd.f32 %v88_v30, %v68_v29  ;;  %v108_v35 = vmul.f32 %v222_v20, %v98_v52 }
  0x27   :  { %v226_v24 = vpop.eup %225  ;;  %v106_v26 = vadd.f32 %v224_v22, %v86_v21 }
  0x28   :  { %v228_v27 = vpop.eup %227  ;;  %v120_v31 = vadd.f32 %v226_v24, %v100_v23  ;;  %v110_v40 = vadd.f32 %v108_v35, %v90_v34  ;;  %v128_v41 = vmul.f32 %v226_v24, %v118_v56 }
  0x29   :  { %v126_v33 = vadd.f32 %v228_v27, %v106_v26 }
  0x2a   :  { %233 = vrcp.f32 %v120_v31  ;;  %v130_v46 = vadd.f32 %v128_v41, %v110_v40 }
  0x2b   :  { %235 = vlog2.f32 %v126_v33 }
  0x2f   :  { %v230_v36 = vpop.eup %229 }
  0x30   :  { %v232_v37 = vpop.eup %231  ;;  %v137_v38 = vmul.f32 %v230_v36, %v129_v32 }
  0x31   :  { %v132_v42 = vmul.f32 0.6931472, %v232_v37 }
  0x33   :  { %v139_v45 = vsub.f32 %v132_v42, %v137_v38 }
  0x35   :  { %v143_v39 = vadd.f32 %v141_v43, %v139_v45 }
  0x37   :  { %v234_v47 = vpop.eup %233  ;;  %145 = vst [vmem:[#allocation2] sm:$0x3] %v143_v39 }
  0x38   :  { %v236_v44 = vpop.eup %235  ;;  %v138_v48 = vmul.f32 %v234_v47, %v130_v46 }
  0x39   :  { %v134_v49 = vmul.f32 0.6931472, %v236_v44 }
  0x3b   :  { %v140_v51 = vsub.f32 %v134_v49, %v138_v48 }
  0x3d   :  { %v144_v53 = vadd.f32 %v142_v50, %v140_v51 }
  0x3e   :  { %v150_v52 = vld [vmem:[#allocation2] sm:$0x3] }
  0x3f   :  { %v153_v54 = vsel %vm152_vm0, %v150_v52, 0.0  ;;  %146 = vst [vmem:[#allocation2 + $0x2] sm:$0x3] %v144_v53 }
  0x40   :  { %154 = vadd.xlane.f32.xlu0 %v153_v54 }
  0x46   :  { %v151_v55 = vld [vmem:[#allocation2 + $0x2] sm:$0x3] }
  0x47   :  { %v156_v56 = vsel %vm152_vm0, %v151_v55, 0.0 }
  0x48   :  { %157 = vadd.xlane.f32.xlu0 %v156_v56 }
  0xc9   :  { %v155_v60 = vpop.xlane.xlu0 %154 }
  0xca   :  { %v166_v63 = vrot.slane %v155_v60, %v165_v61 }
  0xd1   :  { %v158_v62 = vpop.xlane.xlu0 %157 }
  0xd2   :  { %v170_v0 = vrot.slane %v158_v62, %v165_v61 }
  0xd4   :  { %v172_v1 = vsel %vm171_vm1, %v170_v0, %v166_v63 }
  0xd5   :  { %v175_v2 = vsel %vm174_vm2, %v172_v1, 0.0 }
  0xd6   :  { %176 = vadd.xlane.f32.xlu1 %v175_v2 }
 0x15f   :  { %v177_v3 = vpop.xlane.xlu1 %176 }
 0x160   :  { %179 = vst.msk [vmem:[%s318_s2] sm:$0x3] %vm178_vm3, %v177_v3 }

</bundles_post_ra>
